<compile_context>
chip_gen: v5e
topology: v5e:2x2
jax: 0.10.0
libtpu: 0.0.40
codegen_flags: <defaults>
</compile_context>

<pallas_src>
import functools
import math

import jax
import jax.numpy as jnp
import numpy as np
from jax.experimental import pallas as pl
from jax.experimental.pallas import tpu as pltpu


# ----------------------------------------------------------------------------
# Base ("cell") anchors -- equivalent of AnchorGenerator.generate_anchors.
# Computed on host in float32 (trace-time constants).
# ----------------------------------------------------------------------------
def generate_cell_anchors(scales, aspect_ratios):
    scales = np.asarray(scales, np.float32)
    aspect_ratios = np.asarray(aspect_ratios, np.float32)
    h_ratios = np.sqrt(aspect_ratios).astype(np.float32)
    w_ratios = (np.float32(1.0) / h_ratios).astype(np.float32)
    ws = (w_ratios[:, None] * scales[None, :]).reshape(-1)
    hs = (h_ratios[:, None] * scales[None, :]).reshape(-1)
    base = np.stack([-ws, -hs, ws, hs], axis=1).astype(np.float32) / np.float32(2.0)
    # np.round == round-half-to-even == torch.round
    return np.round(base).astype(np.float32)


# ----------------------------------------------------------------------------
# Fused anchor kernel: one grid step = one (tile_rows, 128) lane-dense tile of
# the flattened (N, 4) anchor stream, belonging to exactly one FPN level.
# ----------------------------------------------------------------------------
def _fused_anchor_kernel(lvl_ref, meta_ref, pat_ref, out_ref, *, strip, n_strips):
    del lvl_ref  # only consumed by the pattern BlockSpec index_map
    i = pl.program_id(0)
    # Per-tile scalars (SMEM).
    p0 = meta_ref[0, i]              # spatial position index at tile start
    inv_w = meta_ref[1, i]           # 1 / grid_width
    w_f = meta_ref[2, i]             # grid_width
    s_h = meta_ref[3, i]             # stride_h
    s_w = meta_ref[4, i]             # stride_w
    dpos_per_strip = meta_ref[5, i]  # spatial positions covered by one strip

    # Per-level lane patterns (trace-time constants, DMA'd once per level).
    base = pat_ref[0, 0]             # (strip, 128) base-anchor coord per lane
    is_x = pat_ref[0, 1]             # (strip, 128) 1.0 where lane is an x coord
    dpos = pat_ref[0, 2]             # (strip, 128) spatial offset within a strip

    for s in range(n_strips):        # static unroll; small live set per strip
        p = dpos + (p0 + float(s) * dpos_per_strip)
        # Exact for p < ~4M, W <= few thousand: |err| << 0.5/W around integers.
        row = jnp.floor((p + 0.5) * inv_w)
        col = p - row * w_f
        shift = jnp.where(is_x > 0.5, col * s_w, row * s_h)
        out_ref[pl.ds(s * strip, strip), :] = shift + base


def _fused_grid_anchors(cell_anchors, grid_sizes, strides):
    """All levels' anchors, torchvision order, shape (sum_l H_l*W_l*A_l, 4)."""
    num_levels = len(grid_sizes)
    num_a = [int(b.shape[0]) for b in cell_anchors]

    # Strip rows: the (anchor, coord) lane pattern repeats every lcm(4*A, 128)
    # elements; round the strip up to a sublane-aligned (x8) row count.
    strip = 8
    for a in num_a:
        period_rows = (4 * a) // math.gcd(4 * a, 128)
        strip = strip * period_rows // math.gcd(strip, period_rows)

    elems = [gh * gw * a * 4 for (gh, gw), a in zip(grid_sizes, num_a)]
    total_rows = sum(-(-e // 128) for e in elems)

    # Tile rows: multiple of `strip`, <= ~256 KiB per tile, and >= ~8 tiles for
    # large inputs so the "parallel" grid axis can shard across TensorCores.
    target_rows = min(512, max(strip, total_rows // 8))
    tile_rows = strip * max(1, target_rows // strip)
    tile_elems = tile_rows * 128
    n_strips = tile_rows // strip

    tiles_per_level = [max(1, -(-e // tile_elems)) for e in elems]
    n_tiles = int(sum(tiles_per_level))

    # Per-tile scalar metadata (scalar-prefetched into SMEM).
    lvl_ids = np.zeros((n_tiles,), np.int32)
    meta = np.zeros((6, n_tiles), np.float32)
    t = 0
    for lvl in range(num_levels):
        gh, gw = grid_sizes[lvl]
        s_h, s_w = strides[lvl]
        a = num_a[lvl]
        for k in range(tiles_per_level[lvl]):
            lvl_ids[t] = lvl
            meta[0, t] = (k * tile_elems) // (4 * a)   # p0 (exact: offset % 4A == 0)
            meta[1, t] = np.float32(1.0) / np.float32(gw)
            meta[2, t] = gw
            meta[3, t] = s_h
            meta[4, t] = s_w
            meta[5, t] = (strip * 128) // (4 * a)
            t += 1

    # Per-level lane patterns (trace-time constants).
    kk = np.arange(strip * 128)
    pat = np.zeros((num_levels, 3, strip, 128), np.float32)
    for lvl, (base, a) in enumerate(zip(cell_anchors, num_a)):
        per = 4 * a
        base_flat = np.asarray(base, np.float32).reshape(-1)
        pat[lvl, 0] = base_flat[kk % per].reshape(strip, 128)
        pat[lvl, 1] = (kk % 2 == 0).astype(np.float32).reshape(strip, 128)
        pat[lvl, 2] = (kk // per).astype(np.float32).reshape(strip, 128)

    out = pl.pallas_call(
        functools.partial(_fused_anchor_kernel, strip=strip, n_strips=n_strips),
        out_shape=jax.ShapeDtypeStruct((n_tiles * tile_rows, 128), jnp.float32),
        grid_spec=pltpu.PrefetchScalarGridSpec(
            num_scalar_prefetch=2,
            grid=(n_tiles,),
            in_specs=[
                pl.BlockSpec((1, 3, strip, 128),
                             lambda i, lvl, m: (lvl[i], 0, 0, 0)),
            ],
            out_specs=pl.BlockSpec((tile_rows, 128), lambda i, lvl, m: (i, 0)),
        ),
        compiler_params=pltpu.CompilerParams(
            dimension_semantics=("parallel",)),
    )(jnp.asarray(lvl_ids), jnp.asarray(meta), jnp.asarray(pat))

    flat = out.reshape(-1)
    if all(e == ntl * tile_elems for e, ntl in zip(elems, tiles_per_level)):
        # Exactly packed: metadata-only reshape, no extra HBM pass.
        return flat.reshape(-1, 4)
    # TODO(synk): handle level-boundary-straddling tiles in-kernel (runtime
    # phase of the lane pattern) to emit the exact concatenated stream and
    # drop this slice+concat pass entirely.
    pieces = []
    off = 0
    for e, ntl in zip(elems, tiles_per_level):
        pieces.append(flat[off:off + e])
        off += ntl * tile_elems
    return jnp.concatenate(pieces, axis=0).reshape(-1, 4)


# ----------------------------------------------------------------------------
# ImageList + AnchorGenerator (JAX side)
# ----------------------------------------------------------------------------
class ImageList:
    def __init__(self, tensors, image_sizes):
        self.tensors = tensors
        self.image_sizes = image_sizes


class AnchorGenerator:
    def __init__(self, sizes=((128, 256, 512),), aspect_ratios=((0.5, 1.0, 2.0),)):
        if not isinstance(sizes[0], (list, tuple)):
            sizes = tuple((s,) for s in sizes)
        if not isinstance(aspect_ratios[0], (list, tuple)):
            aspect_ratios = (aspect_ratios,) * len(sizes)
        self.sizes = sizes
        self.aspect_ratios = aspect_ratios
        self.cell_anchors = [
            generate_cell_anchors(s, a) for s, a in zip(sizes, aspect_ratios)
        ]
        self._cache = {}

    def num_anchors_per_location(self):
        return [len(s) * len(a) for s, a in zip(self.sizes, self.aspect_ratios)]

    def __call__(self, image_list, feature_maps):
        grid_sizes = tuple(tuple(int(d) for d in fm.shape[-2:]) for fm in feature_maps)
        image_size = tuple(int(d) for d in image_list.tensors.shape[-2:])
        # Floor division matches torchvision (truncates for non-exact divisors).
        strides = tuple(
            (image_size[0] // g[0], image_size[1] // g[1]) for g in grid_sizes
        )
        key = (grid_sizes, strides)
        if key not in self._cache:
            # Anchors depend only on static shapes: run the kernel once per
            # shape configuration and reuse the result every step.
            self._cache[key] = _fused_grid_anchors(self.cell_anchors, grid_sizes, strides)
        all_anchors = self._cache[key]
        # Shared (immutable) across the batch instead of duplicating data.
        return [all_anchors for _ in range(len(image_list.image_sizes))]


# ----------------------------------------------------------------------------
# Pure-JAX reference (sanity check)
# ----------------------------------------------------------------------------
def _reference_level(base, gh, gw, sh, sw):
    shifts_x = jnp.arange(0, gw, dtype=jnp.int32) * sw
    shifts_y = jnp.arange(0, gh, dtype=jnp.int32) * sh
    shift_y, shift_x = jnp.meshgrid(shifts_y, shifts_x, indexing="ij")
    shift_x = shift_x.reshape(-1)
    shift_y = shift_y.reshape(-1)
    shifts = jnp.stack((shift_x, shift_y, shift_x, shift_y), axis=1).astype(jnp.float32)
    return (shifts.reshape(-1, 1, 4) + jnp.asarray(base).reshape(1, -1, 4)).reshape(-1, 4)


if __name__ == "__main__":
    key = jax.random.PRNGKey(0)
    k1, k2, k3, k4 = jax.random.split(key, 4)

    batch, channels = 2, 4
    img_h, img_w = 64, 64
    images = jax.random.normal(k1, (batch, channels, img_h, img_w), jnp.float32)
    image_sizes = [(60, 64), (64, 58)]  # original (pre-padding) sizes
    image_list = ImageList(images, image_sizes)

    # Three FPN levels: 16x16 (stride 4), 8x8 (stride 8), 5x5 (stride 12, also
    # exercises a level whose anchor stream is not a multiple of 128). NCHW.
    feat0 = jax.random.normal(k2, (batch, channels, 16, 16), jnp.float32)
    feat1 = jax.random.normal(k3, (batch, channels, 8, 8), jnp.float32)
    feat2 = jax.random.normal(k4, (batch, channels, 5, 5), jnp.float32)
    feature_maps = [feat0, feat1, feat2]

    gen = AnchorGenerator(
        sizes=((32,), (64,), (128,)),
        aspect_ratios=((0.5, 1.0, 2.0), (0.5, 1.0, 2.0), (0.5, 1.0, 2.0)))

    anchors = gen(image_list, feature_maps)
    anchors = [jax.block_until_ready(a) for a in anchors]

    # sanity check against pure-JAX reference (exact equality expected)
    ref_levels = [
        _reference_level(gen.cell_anchors[0], 16, 16, 4, 4),
        _reference_level(gen.cell_anchors[1], 8, 8, 8, 8),
        _reference_level(gen.cell_anchors[2], 5, 5, 12, 12),
    ]
    ref = np.asarray(jnp.concatenate(ref_levels, axis=0))
    n_expect = (16 * 16 + 8 * 8 + 5 * 5) * 3
    assert len(anchors) == batch
    assert anchors[0].shape == (n_expect, 4)
    np.testing.assert_allclose(np.asarray(anchors[0]), ref, atol=0, rtol=0)
    np.testing.assert_allclose(np.asarray(anchors[1]), ref, atol=0, rtol=0)

    print("KERNEL_OK")
</pallas_src>

<mosaic_0001>
module attributes {stable_mosaic.version = 11 : i64} {
  func.func @_fused_anchor_kernel(%arg0: i32, %arg1: memref<3xi32, #tpu.memory_space<smem>>, %arg2: memref<6x3xf32, #tpu.memory_space<smem>>, %arg3: memref<1x3x24x128xf32, #tpu.memory_space<vmem>>, %arg4: memref<24x128xf32, #tpu.memory_space<vmem>>) attributes {dimension_semantics = [#tpu.dimension_semantics<parallel>], iteration_bounds = array<i64: 3>, scalar_prefetch = 2 : i64, scratch_operands = 0 : i64, tpu.core_type = #tpu.core_type<tc>, window_params = [{transform_indices = @transform_0, window_bounds = array<i64: 1, 3, 24, 128>}, {transform_indices = @transform_1, window_bounds = array<i64: 24, 128>}]} {
    %c0 = arith.constant 0 : index
    %0 = arith.index_cast %arg0 : i32 to index
    %1 = memref.load %arg2[%c0, %0] : memref<6x3xf32, #tpu.memory_space<smem>>
    %c1 = arith.constant 1 : index
    %2 = arith.index_cast %arg0 : i32 to index
    %3 = memref.load %arg2[%c1, %2] : memref<6x3xf32, #tpu.memory_space<smem>>
    %c2 = arith.constant 2 : index
    %4 = arith.index_cast %arg0 : i32 to index
    %5 = memref.load %arg2[%c2, %4] : memref<6x3xf32, #tpu.memory_space<smem>>
    %c3 = arith.constant 3 : index
    %6 = arith.index_cast %arg0 : i32 to index
    %7 = memref.load %arg2[%c3, %6] : memref<6x3xf32, #tpu.memory_space<smem>>
    %c4 = arith.constant 4 : index
    %8 = arith.index_cast %arg0 : i32 to index
    %9 = memref.load %arg2[%c4, %8] : memref<6x3xf32, #tpu.memory_space<smem>>
    %c5 = arith.constant 5 : index
    %10 = arith.index_cast %arg0 : i32 to index
    %11 = memref.load %arg2[%c5, %10] : memref<6x3xf32, #tpu.memory_space<smem>>
    %c0_0 = arith.constant 0 : index
    %c0_1 = arith.constant 0 : index
    %c0_2 = arith.constant 0 : index
    %c0_3 = arith.constant 0 : index
    %12 = vector.load %arg3[%c0_0, %c0_1, %c0_2, %c0_3] : memref<1x3x24x128xf32, #tpu.memory_space<vmem>>, vector<1x1x24x128xf32>
    %13 = vector.shape_cast %12 : vector<1x1x24x128xf32> to vector<24x128xf32>
    %c0_4 = arith.constant 0 : index
    %c1_5 = arith.constant 1 : index
    %c0_6 = arith.constant 0 : index
    %c0_7 = arith.constant 0 : index
    %14 = vector.load %arg3[%c0_4, %c1_5, %c0_6, %c0_7] : memref<1x3x24x128xf32, #tpu.memory_space<vmem>>, vector<1x1x24x128xf32>
    %15 = vector.shape_cast %14 : vector<1x1x24x128xf32> to vector<24x128xf32>
    %c0_8 = arith.constant 0 : index
    %c2_9 = arith.constant 2 : index
    %c0_10 = arith.constant 0 : index
    %c0_11 = arith.constant 0 : index
    %16 = vector.load %arg3[%c0_8, %c2_9, %c0_10, %c0_11] : memref<1x3x24x128xf32, #tpu.memory_space<vmem>>, vector<1x1x24x128xf32>
    %17 = vector.shape_cast %16 : vector<1x1x24x128xf32> to vector<24x128xf32>
    %cst = arith.constant 0.000000e+00 : f32
    %18 = arith.mulf %cst, %11 : f32
    %19 = arith.addf %1, %18 : f32
    %20 = vector.broadcast %19 : f32 to vector<24x128xf32>
    %21 = arith.addf %17, %20 : vector<24x128xf32>
    %cst_12 = arith.constant 5.000000e-01 : f32
    %22 = vector.broadcast %cst_12 : f32 to vector<24x128xf32>
    %23 = arith.addf %21, %22 : vector<24x128xf32>
    %24 = vector.broadcast %3 : f32 to vector<24x128xf32>
    %25 = arith.mulf %23, %24 : vector<24x128xf32>
    %26 = math.floor %25 : vector<24x128xf32>
    %27 = vector.broadcast %5 : f32 to vector<24x128xf32>
    %28 = arith.mulf %26, %27 : vector<24x128xf32>
    %29 = arith.subf %21, %28 : vector<24x128xf32>
    %cst_13 = arith.constant 5.000000e-01 : f32
    %30 = vector.broadcast %cst_13 : f32 to vector<24x128xf32>
    %31 = arith.cmpf ogt, %15, %30 : vector<24x128xf32>
    %32 = vector.broadcast %9 : f32 to vector<24x128xf32>
    %33 = arith.mulf %29, %32 : vector<24x128xf32>
    %34 = vector.broadcast %7 : f32 to vector<24x128xf32>
    %35 = arith.mulf %26, %34 : vector<24x128xf32>
    %36 = arith.select %31, %33, %35 : vector<24x128xi1>, vector<24x128xf32>
    %37 = arith.addf %36, %13 : vector<24x128xf32>
    %c0_14 = arith.constant 0 : index
    %c0_15 = arith.constant 0 : index
    %38 = vector.load %arg4[%c0_14, %c0_15] : memref<24x128xf32, #tpu.memory_space<vmem>>, vector<24x128xf32>
    tpu.vector_store %arg4[%c0_14, %c0_15], %37 {strides = array<i32>} : memref<24x128xf32, #tpu.memory_space<vmem>>, vector<24x128xf32>,
    return
  }
  func.func @transform_0(%arg0: i32, %arg1: memref<3xi32, #tpu.memory_space<smem>>, %arg2: memref<6x3xf32, #tpu.memory_space<smem>>) -> (i32, i32, i32, i32) {
    %0 = arith.index_cast %arg0 : i32 to index
    %1 = memref.load %arg1[%0] : memref<3xi32, #tpu.memory_space<smem>>
    %c0_i32 = arith.constant 0 : i32
    %c0_i32_0 = arith.constant 0 : i32
    %c0_i32_1 = arith.constant 0 : i32
    %c0_i32_2 = arith.constant 0 : i32
    return %1, %c0_i32, %c0_i32_0, %c0_i32_1 : i32, i32, i32, i32
  }
  func.func @transform_1(%arg0: i32, %arg1: memref<3xi32, #tpu.memory_space<smem>>, %arg2: memref<6x3xf32, #tpu.memory_space<smem>>) -> (i32, i32) {
    %c0_i32 = arith.constant 0 : i32
    %c0_i32_0 = arith.constant 0 : i32
    return %arg0, %c0_i32 : i32, i32
  }
}

</mosaic_0001>

<bundles_post_ra>
// kernel: tpu_custom_call.1
= control target key start
LH: loop header
LB: loop body
LE: loop exit
PB: predicated region body
PF: predicated region fallthrough
CT: control target
= control target key end

     0   :  { %s587_s18 = smov [#allocation3]   ;;  %s588_s19 = smov [#allocation4]   ;;  %s795_s0 = inlined_call_operand.vmem [shape: s32[3], index: 0, kind: input, shape index: {}]   ;;  %s796_s2 = inlined_call_operand.hbm [shape: f32[3,3,24,128], index: 2, kind: input, shape index: {}]   ;;  %s797_s3 = inlined_call_operand.hbm [shape: f32[72,128], index: 3, kind: output, shape index: {}]   ;;  %s798_s1 = inlined_call_operand.vmem [shape: f32[6,3], index: 1, kind: input, shape index: {}]  }
   0x1   :  { %800 = sst [smem:[#allocation16_spill]] %s796_s2  ;;  %s9_s14 = sshll.u32 %s795_s0, 4  ;;  %s10_s14 = int_to_ptr.vmem [resolvable:$true] %s9_s14 }
   0x2   :  { %s14_s17 = sshll.u32 %s798_s1, 4  ;;  %s15_s17 = int_to_ptr.vmem [resolvable:$true] %s14_s17 }
   0x3   :  { %12 = dma.vmem_to_smem %s10_s14, 16, %s587_s18, [#allocation2] }
   0x4   :  { %17 = dma.vmem_to_smem %s15_s17, 128, %s588_s19, [#allocation2] }
   0x5   :  { %549 = dma.done.wait [#allocation2], 144 }
   0x6   :  { %550 = vsyncadd [#allocation2], 4294967152 }
   0x7   :  { %20 = sfence }
   0x8   :  { %21 = vsyncpa [#allocation6], 0 }
   0x9   :  { %23 = vsyncpa [#allocation6 + $0x1], 0 }
   0xa   :  { %24 = vsyncpa [#allocation7], 0 }
   0xb   :  { %26 = vsyncpa [#allocation7 + $0x1], 0  ;;  %s619_s20 = smov 0   ;;  %s621_s0 = smov 0  }
   0xc   :  { %s623_s21 = smov 0   ;;  %s625_s1 = smov 0  }
   0xd   :  { %s627_s22 = smov 0   ;;  %s629_s23 = smov 0  }
   0xe   :  { %s631_s24 = smov 0  }
   0xf LB: > { %801 = sst [smem:[#allocation14_spill]] %s581_s23  ;;  %s653_s25 = sadd.s32 4294967295, %s585_s24   ;;  %s585_s24 = sphi %s631_s24, %s817_s24   ;;  %s581_s23 = sphi %s629_s23, %s811_s23   ;;  %s577_s22 = sphi %s627_s22, %s816_s22   ;;  %s573_s1 = sphi %s625_s1, %s815_s1   ;;  %s569_s21 = sphi %s623_s21, %s814_s21   ;;  %s565_s0 = sphi %s621_s0, %s813_s0   ;;  %s561_s20 = sphi %s619_s20, %s812_s20  }
  0x10   : > { %s325_s26 = sadd.s32 4294967294, %s585_s24   ;;  %s657_s27 = sadd.s32 1, %s585_s24  }
  0x11   : > { %s36_s28 = sld [smem:[#allocation3 + %s585_s24]]  ;;  %s41_s30 = sadd.s32 1, %s581_s23 }
  0x12   : > { %s37_s29 = sld [smem:[#allocation3 + %s657_s27]]  ;;  %p48_p0 = scmp.ne.s32.totalorder %s581_s23, %s577_s22 }
  0x13   : > { %p49_p1 = scmp.eq.s32.totalorder %s585_s24, 0  ;;  %p54_p2 = scmp.ne.s32.totalorder %s577_s22, %s573_s1 }
  0x14   : > { %p55_p3 = scmp.eq.s32.totalorder %s653_s25, 0  ;;  %s64_s5 = ssub.s32 %s585_s24, %s657_s27 }
  0x15   : > { %p667_p4 = por %p49_p1, %p48_p0  ;;  %p65_p6 = scmp.eq.s32.totalorder %s64_s5, 0 }
  0x16   : > { %p673_p5 = por %p55_p3, %p54_p2  ;;  %s67_s7 = sadd.s32 1, %s569_s21 }
  0x17   : > { %p77_p7 = scmp.ne.s32.totalorder %s569_s21, %s565_s0  ;;  %p78_p8 = scmp.eq.s32.totalorder %s653_s25, 2 }
  0x18   : > { %s38_s8 = ssub.s32 %s36_s28, %s37_s29  ;;  %p83_p10 = scmp.ne.s32.totalorder %s565_s0, %s561_s20 }
  0x19   : > { %p39_p9 = scmp.eq.s32.totalorder %s38_s8, 0  ;;  %p689_p11 = por %p78_p8, %p77_p7 }
  0x1a   : > { %s684_s9 = scalar_select %p65_p6, %s569_s21, %s67_s7  }
  0x1b   : > { %s687_s10 = scalar_select %p39_p9, %s581_s23, %s41_s30  }
  0x1c   : > { %p84_p12 = scmp.eq.s32.totalorder %s325_s26, 2  ;;  %s104_s13 = sand.u32 1, %s581_s23  }
  0x1d   : > { %804 = sst [smem:[#allocation15_spill]] %s687_s10  ;;  %p375_p0 = scmp.lt.s32.totalorder %s585_s24, 3 }
  0x1e   : > { %p693_p13 = por %p84_p12, %p83_p10  ;;  %s355_s15 = smul.u32 72, %s104_s13 }
  0x1f   : > { %s359_s14 = scalar_select %p667_p4, [#allocation3], [#allocation9] }
  0x20   : > { %p703_p1 = pnand %p375_p0, %p667_p4  ;;  %p329_p2 = scmp.ge.s32.totalorder %s585_s24, 1 }
  0x21   : > { %s360_s17 = scalar_select %p667_p4, %s585_s24, 0 }
  0x22   : > { %s819_s14 = smov (!%p375_p0, %s359_s14), [#allocation10]  ;;  %p125_p3 = scmp.lt.s32.totalorder %s585_s24, 4 }
  0x23   : > { %s821_s17 = smov (!%p375_p0, %s360_s17), 0  ;;  %s108_s19 = scalar_lea.vmem [#allocation5], %s355_s15 }
  0x24   : > { %s109_s18 = sld [smem:[%s819_s14 + %s821_s17]]  ;;  %s117_s1 = sshll.u32 %s108_s19, 4  ;;  %s118_s1 = int_to_ptr.vmem [resolvable:$true] %s117_s1 }
  0x25   : > { %p712_p6 = pnand %p329_p2, %p125_p3  ;;  %s809_s2 = sld [smem:[#allocation16_spill]] }
  0x26   : > { %s105_s7 = scalar_lea.sflag [#allocation6], %s104_s13  ;;  %p467_p7 = pneg %p703_p1 }
  0x2a   : > { %s356_s28 = smul.u32 72, %s109_s18 }
  0x2b   : > { %s470_s18 = scalar_lea.hbm %s809_s2, 216 }
  0x2c   : > { %s114_s5 = scalar_lea.hbm %s809_s2, %s356_s28 }
  0x2d   : > { %s115_s4 = sshll.u32 %s114_s5, 4  ;;  %s116_s4 = int_to_ptr.hbm [resolvable:$true] %s115_s4 }
  0x2e   : > { %s463_s8 = sshra.s32 %s116_s4, 4  ;;  %s464_s8 = int_to_ptr.hbm [resolvable:$true] %s463_s8 }
  0x2f   : > { %s465_s14 = scalar_lea.hbm %s464_s8, 72  ;;  %p471_p10 = scmp.lt.s32.totalorder %s464_s8, %s809_s2 }
  0x30   : > { %p466_p4 = scmp.ne.s32.totalorder %s464_s8, %s465_s14  ;;  %p472_p12 = scmp.lt.s32.totalorder %s470_s18, %s465_s14 }
  0x32   : > { %p468_p8 = pnand %p467_p7, %p466_p4  ;;  %p473_p0 = por %p472_p12, %p471_p10 }
  0x34   : > { %p469_p9 = pneg %p468_p8 }
  0x36   : > { %p474_p2 = pnand %p473_p0, %p469_p9 }
  0x38   : > { %477 = shalt.err (!%p474_p2)
}
  0x39   : > { %s589_s13 = smov 128   ;;  %s590_s28 = smov 8  }
  0x3a   : > { %370 = dma.hbm_to_vmem [thread:$0]  (!%p703_p1), %s116_s4, 1152, %s118_s1, %s105_s7, %s589_s13, %s589_s13, %s590_s28  }
  0x3b   : > { %129 = sbr.rel (%p712_p6) target bundleno = 103 (0x67), region = 24  ;;  %s131_s29 = sand.u32 (!%p712_p6), 1, %s577_s22  }
  0x3c   : > { %s357_s30 = smul.u32 (!%p712_p6), 72, %s131_s29  ;;  %s132_s5 = scalar_lea.sflag (!%p712_p6), [#allocation6], %s131_s29 }
  0x3e   : > { %s732_s15 = scalar_lea.vmem (!%p712_p6), [#allocation5], %s357_s30 }
  0x40   : > { %552 = dma.done.wait (%p673_p5), %s132_s5, 1152  }
  0x41   : > { %554 = vsyncadd (%p673_p5), %s132_s5, 4294966144  ;;  %s158_s10 = sshra.s32 %s653_s25, 7  ;;  %s163_s1 = sand.u32 127, %s653_s25  ;;  %v338_v0 = vld [vmem:[%s732_s15 + $0x30] sm:$0xff]  ;;  %v339_v1 = vld [vmem:[%s732_s15 + $0x38] sm:$0xff] }
  0x42   : > { %s344_s16 = sshll.u32 %s158_s10, 7  ;;  %s157_s7 = sld [smem:[#allocation4 + %s653_s25]]  ;;  %v340_v2 = vld [vmem:[%s732_s15 + $0x40] sm:$0xff]  ;;  %v335_v19 = vld [vmem:[%s732_s15 + $0x18] sm:$0xff]  ;;  %v337_v24 = vld [vmem:[%s732_s15 + $0x28] sm:$0xff] }
  0x43   : > { %s345_s26 = sadd.s32 128, %s344_s16  ;;  %s353_s4 = sadd.s32 640, %s344_s16  ;;  %v336_v21 = vld [vmem:[%s732_s15 + $0x20] sm:$0xff]  ;;  %vm216_vm0 = vcmp.gt.f32.partialorder %v335_v19, 0.5  ;;  %v183_v34 = vld [vmem:[%s732_s15 + $0x8] sm:$0xff]  ;;  %vm218_vm2 = vcmp.gt.f32.partialorder %v337_v24, 0.5 }
  0x44   : > { %s180_s8 = sadd.s32 %s353_s4, %s163_s1  ;;  %s164_s14 = sadd.s32 %s345_s26, %s163_s1  ;;  %vm217_vm1 = vcmp.gt.f32.partialorder %v336_v21, 0.5  ;;  %v182_v32 = vld [vmem:[%s732_s15] sm:$0xff]  ;;  %v184_v36 = vld [vmem:[%s732_s15 + $0x10] sm:$0xff] }
  0x45   : > { %s181_s17 = sld [smem:[#allocation4 + %s180_s8]]  ;;  %s347_s18 = sadd.s32 256, %s344_s16 }
  0x46   : > { %s165_s19 = sld [smem:[#allocation4 + %s164_s14]]  ;;  %s168_s13 = sadd.s32 %s347_s18, %s163_s1 }
  0x47   : > { %s349_s6 = sadd.s32 384, %s344_s16  ;;  %s351_s28 = sadd.s32 512, %s344_s16 }
  0x48   : > { %s169_s30 = sld [smem:[#allocation4 + %s168_s13]]  ;;  %s172_s5 = sadd.s32 %s349_s6, %s163_s1 }
  0x49   : > { %s176_s2 = sadd.s32 %s351_s28, %s163_s1  ;;  %s173_s23 = sld [smem:[#allocation4 + %s172_s5]] }
  0x4a   : > { %s177_s26 = sld [smem:[#allocation4 + %s176_s2]]  ;;  %s152_s16 = sand.u32 1, %s565_s0  }
  0x4b   : > { %s193_s29 = smul.f32 0.0, %s181_s17  ;;  %s237_s17 = scalar_lea.sflag [#allocation7], %s152_s16 }
  0x4c   : > { %v202_v7 = vstv %s165_s19  ;;  %s358_s1 = smul.u32 24, %s152_s16  ;;  %s513_s6 = scalar_lea.hbm %s797_s3, 72 }
  0x4d   : > { %s194_s10 = sadd.f32 %s193_s29, %s157_s7  ;;  %s354_s4 = smul.u32 24, %s653_s25 }
  0x4e   : > { %v209_v14 = vstv %s169_s30  ;;  %s154_s7 = scalar_lea.vmem [#allocation8], %s358_s1 }
  0x4f   : > { %v195_v3 = vstv %s194_s10  ;;  %v223_v18 = vstv %s173_s23  ;;  %s248_s25 = scalar_lea.hbm %s797_s3, %s354_s4  ;;  %s249_s8 = sshll.u32 %s154_s7, 4  ;;  %s250_s8 = int_to_ptr.vmem [resolvable:$true] %s249_s8 }
  0x50   : > { %v196_v4 = vadd.f32 %v338_v0, %v195_v3  ;;  %v197_v5 = vadd.f32 %v339_v1, %v195_v3  ;;  %v198_v6 = vadd.f32 %v340_v2, %v195_v3  ;;  %v219_v23 = vstv %s177_s26  ;;  %s251_s14 = sshll.u32 %s248_s25, 4  ;;  %s252_s14 = int_to_ptr.hbm [resolvable:$true] %s251_s14 }
  0x51   : > { %s507_s18 = sshra.s32 %s252_s14, 4  ;;  %s508_s18 = int_to_ptr.hbm [resolvable:$true] %s507_s18 }
  0x52   : > { %v199_v8 = vadd.f32 0.5, %v196_v4  ;;  %v200_v9 = vadd.f32 0.5, %v197_v5  ;;  %v201_v10 = vadd.f32 0.5, %v198_v6  ;;  %s509_s19 = scalar_lea.hbm %s508_s18, 24  ;;  %p514_p6 = scmp.lt.s32.totalorder %s508_s18, %s797_s3 }
  0x53   : > { %p510_p5 = scmp.ne.s32.totalorder %s508_s18, %s509_s19  ;;  %p515_p4 = scmp.lt.s32.totalorder %s513_s6, %s509_s19 }
  0x54   : > { %v203_v11 = vmul.f32 %v202_v7, %v199_v8  ;;  %v204_v12 = vmul.f32 %v202_v7, %v200_v9  ;;  %v205_v13 = vmul.f32 %v202_v7, %v201_v10 }
  0x55   : > { %p511_p1 = pnand %p510_p5, %p689_p11  ;;  %p516_p7 = por %p515_p4, %p514_p6 }
  0x56   : > { %v206_v15 = vfloor.f32 %v203_v11  ;;  %v207_v16 = vfloor.f32 %v204_v12  ;;  %v208_v17 = vfloor.f32 %v205_v13 }
  0x57   : > { %p512_p3 = pneg %p511_p1 }
  0x58   : > { %v210_v20 = vmul.f32 %v209_v14, %v206_v15  ;;  %v211_v22 = vmul.f32 %v209_v14, %v207_v16  ;;  %v212_v25 = vmul.f32 %v209_v14, %v208_v17  ;;  %v224_v27 = vmul.f32 %v223_v18, %v206_v15 }
  0x59   : > { %v225_v29 = vmul.f32 %v223_v18, %v207_v16  ;;  %v226_v31 = vmul.f32 %v223_v18, %v208_v17  ;;  %p517_p8 = pnand %p516_p7, %p512_p3 }
  0x5a   : > { %v213_v26 = vsub.f32 %v196_v4, %v210_v20  ;;  %v214_v28 = vsub.f32 %v197_v5, %v211_v22  ;;  %v215_v30 = vsub.f32 %v198_v6, %v212_v25 }
  0x5c   : > { %v220_v33 = vmul.f32 %v219_v23, %v213_v26  ;;  %v221_v35 = vmul.f32 %v219_v23, %v214_v28  ;;  %v222_v37 = vmul.f32 %v219_v23, %v215_v30 }
  0x5e   : > { %v227_v38 = vsel %vm216_vm0, %v220_v33, %v224_v27  ;;  %v228_v39 = vsel %vm217_vm1, %v221_v35, %v225_v29  ;;  %v229_v42 = vsel %vm218_vm2, %v222_v37, %v226_v31 }
  0x5f   : > { %v230_v40 = vadd.f32 %v227_v38, %v182_v32  ;;  %v231_v41 = vadd.f32 %v228_v39, %v183_v34  ;;  %v232_v43 = vadd.f32 %v229_v42, %v184_v36 }
  0x61   : > { %233 = vst [vmem:[%s154_s7] sm:$0xff] %v230_v40 }
  0x62   : > { %234 = vst [vmem:[%s154_s7 + $0x8] sm:$0xff] %v231_v41 }
  0x63   : > { %235 = vst [vmem:[%s154_s7 + $0x10] sm:$0xff] %v232_v43 }
  0x64   : > { %520 = shalt.err (!%p517_p8)
}
  0x65   : > { %s591_s30 = smov 128   ;;  %s592_s5 = smov 8  }
  0x66   : > { %363 = dma.vmem_to_hbm [thread:$0]  (%p689_p11), %s250_s8, 384, %s252_s14, %s237_s17, %s591_s30, %s591_s30, %s592_s5  }
  0x67 PF: > { %p376_p9 = scmp.ge.s32.totalorder %s585_s24, 2  ;;  %s266_s10 = sand.u32 1, %s561_s20  }
  0x68   : > { %s267_s26 = scalar_lea.sflag [#allocation7], %s266_s10 }
  0x69   : > { %p372_p10 = pnand %p376_p9, %p693_p13 }
  0x6b   : > { %p373_p12 = pneg %p372_p10 }
  0x6d   : > { %556 = dma.done.wait (%p373_p12), %s267_s26, 384  }
  0x6e   : > { %558 = vsyncadd (%p373_p12), %s267_s26, 4294966912  ;;  %s810_s16 = sld [smem:[#allocation14_spill]]  ;;  %p29_p11 = scmp.ge.s32.totalorder %s657_s27, 5  }
  0x6f   : > { %s811_s23 = sld [smem:[#allocation15_spill]]  ;;  %s812_s20 = smov %s565_s0 }
  0x70   : > { %s813_s0 = smov %s569_s21  ;;  %s814_s21 = smov %s684_s9 }
  0x71   : > { %s815_s1 = smov %s577_s22  ;;  %s817_s24 = smov %s657_s27 }
  0x72   :  { %31 = sbr.rel (!%p29_p11) target bundleno = 15 (0xf), region = 71 }
  0x74   : > { %s816_s22 = smov %s810_s16 }
  0x77   :  { %273 = vsyncpa [#allocation6], 1 }
  0x78   :  { %275 = vsyncpa [#allocation6 + $0x1], 1 }
  0x79   :  { %276 = vsyncpa [#allocation7], 1 }
  0x7a   :  { %278 = vsyncpa [#allocation7 + $0x1], 1 }

</bundles_post_ra>
